<compile_context>
chip_gen: v6e
topology: v6e:2x2x1
jax: 0.10.0
libtpu: 0.0.40
codegen_flags: <defaults>
</compile_context>

<pallas_src>
import functools

import jax
import jax.numpy as jnp
from jax.experimental import pallas as pl
from jax.experimental.pallas import tpu as pltpu


def _round_up(x, m):
    return -(-x // m) * m


def _mlp_row_kernel(x_ref, w1_ref, b1_ref, w2_ref, b2_ref, w3_ref, out_ref,
                    *, matmul_dtype):
    """3-layer MLP (ReLU, ReLU, 1-unit linear) over a block of action rows."""
    f32 = jnp.float32
    x = x_ref[...]                                           # (RB, 2E)

    # Layer 1: single K=2E MXU pass (op/ma halves already concatenated).
    h = jnp.dot(x.astype(matmul_dtype), w1_ref[...].astype(matmul_dtype),
                preferred_element_type=f32) + b1_ref[...]
    h = jnp.maximum(h, 0.0)

    # Layer 2: K=H MXU pass.
    h = jnp.dot(h.astype(matmul_dtype), w2_ref[...].astype(matmul_dtype),
                preferred_element_type=f32) + b2_ref[...]
    h = jnp.maximum(h, 0.0)                                  # (RB, H) f32

    # Output layer has a single unit: VPU multiply + lane reduce instead of a
    # degenerate 1-column MXU matmul.  b3 / no-op row are added in the wrapper.
    out_ref[...] = jnp.sum(h * w3_ref[...], axis=-1, keepdims=True)   # (RB, 1)


def jssp_actor_forward(next_op, op_emb, ma_emb, ops_ma_adj, action_mask, params,
                       *, row_block=256, matmul_dtype=jnp.float32):
    """Pallas implementation of JSSPActor.forward (het_emb=True path).

    Set matmul_dtype=jnp.bfloat16 on v6e/v7x for 2x MXU throughput and half
    the kernel DMA bytes (f32 accumulation is kept via preferred_element_type);
    the f32 default matches the torch module up to summation order.
    """
    bs, O, E = op_emb.shape
    J = next_op.shape[1]
    H = params["w1"].shape[1]
    D = 2 * E

    w1, b1 = params["w1"], params["b1"]          # (2E, H), (1, H)
    w2, b2 = params["w2"], params["b2"]          # (H, H), (1, H)
    w3, b3 = params["w3"], params["b3"]          # (H, 1), (1, 1)
    w3_row = w3.T                                # (1, H) for the VPU reduce

    # --- gather / adjacency contraction hoisted out of the kernel ------------
    # (native XLA batched matmul + gather; avoids per-sample degenerate MXU
    #  einsums inside the kernel and cuts kernel DMA to one (rows, 2E) tensor)
    ma_per_op = jnp.einsum("bmo,bme->boe", ops_ma_adj, ma_emb)        # (B, O, E)
    bidx = jnp.arange(bs)[:, None]
    job_op = op_emb[bidx, next_op]                                    # (B, J, E)
    job_ma = ma_per_op[bidx, next_op]                                 # (B, J, E)
    x = jnp.concatenate([job_op, job_ma], axis=-1).reshape(bs * J, D)

    use_bf16 = jnp.dtype(matmul_dtype) == jnp.dtype(jnp.bfloat16)
    if use_bf16:
        x = x.astype(jnp.bfloat16)      # halve DMA bytes of the kernel input

    # --- row blocking ---------------------------------------------------------
    rows = bs * J
    # >= 2 grid steps when possible (v7x dual TensorCore), blocks multiple of 8.
    rb = min(int(row_block), _round_up(max(-(-rows // 2), 8), 8))
    rb = max(8, _round_up(rb, 8))
    rows_pad = _round_up(rows, rb)
    if rows_pad != rows:
        x = jnp.pad(x, ((0, rows_pad - rows), (0, 0)))

    grid = (rows_pad // rb,)

    cost = pl.CostEstimate(
        flops=int(rows_pad * (2 * D * H + 2 * H * H + 2 * H)),
        transcendentals=0,
        bytes_accessed=int(rows_pad * D * x.dtype.itemsize
                           + (D * H + H * H + 3 * H + 1) * 4
                           + rows_pad * 4),
    )

    def fixed(shape):
        n = len(shape)
        return pl.BlockSpec(shape, lambda i, n=n: (0,) * n)

    out = pl.pallas_call(
        functools.partial(_mlp_row_kernel, matmul_dtype=matmul_dtype),
        out_shape=jax.ShapeDtypeStruct((rows_pad, 1), jnp.float32),
        grid=grid,
        in_specs=[
            pl.BlockSpec((rb, D), lambda i: (i, 0)),     # stacked action rows
            fixed((D, H)), fixed((1, H)),                # w1, b1
            fixed((H, H)), fixed((1, H)),                # w2, b2
            fixed((1, H)),                               # w3 (as a row)
        ],
        out_specs=pl.BlockSpec((rb, 1), lambda i: (i, 0)),
        compiler_params=pltpu.CompilerParams(
            dimension_semantics=("parallel",)),
        cost_estimate=cost,
    )(x, w1, b1, w2, b2, w3_row)

    # strip padding, add output bias
    job_logits = out[:rows, 0].reshape(bs, J) + b3[0, 0]              # (bs, J)

    # batch-independent "no-op" (dummy) action logit, computed once outside
    d = params["dummy"]                                               # (1, 2E)
    hd = jax.nn.relu(d @ w1 + b1)
    hd = jax.nn.relu(hd @ w2 + b2)
    noop_logit = hd @ w3 + b3                                         # (1, 1)
    logits = jnp.concatenate(
        [jnp.broadcast_to(noop_logit, (bs, 1)), job_logits], axis=1)  # (bs, J+1)

    return logits, action_mask                     # mask passed through unchanged


def _reference(next_op, op_emb, ma_emb, ops_ma_adj, params):
    """Plain-JAX replica of the torch forward for correctness checking."""
    bs = op_emb.shape[0]
    ma_per_op = jnp.einsum("bmo,bme->boe", ops_ma_adj, ma_emb)
    bidx = jnp.arange(bs)[:, None]
    job_op = op_emb[bidx, next_op]                 # (B, J, E)
    job_ma = ma_per_op[bidx, next_op]              # (B, J, E)
    job_emb = jnp.concatenate([job_op, job_ma], axis=2)
    no_ops = jnp.broadcast_to(params["dummy"][None], (bs, 1, job_emb.shape[-1]))
    x = jnp.concatenate([no_ops, job_emb], axis=1)
    h = jax.nn.relu(x @ params["w1"] + params["b1"][0])
    h = jax.nn.relu(h @ params["w2"] + params["b2"][0])
    return (h @ params["w3"] + params["b3"][0])[..., 0]


def _init_params(key, embed_dim, hidden_dim):
    """Deterministic init mimicking torch defaults (uniform +-1/sqrt(fan_in))."""
    D = 2 * embed_dim  # het_emb=True -> input_dim = 2 * embed_dim
    ks = jax.random.split(key, 7)

    def lin(kw, kb, fan_in, fan_out):
        bound = 1.0 / jnp.sqrt(fan_in)
        w = jax.random.uniform(kw, (fan_in, fan_out), jnp.float32, -bound, bound)
        b = jax.random.uniform(kb, (1, fan_out), jnp.float32, -bound, bound)
        return w, b

    w1, b1 = lin(ks[0], ks[1], D, hidden_dim)
    w2, b2 = lin(ks[2], ks[3], hidden_dim, hidden_dim)
    w3, b3 = lin(ks[4], ks[5], hidden_dim, 1)
    dummy = jax.random.uniform(ks[6], (1, D), jnp.float32)  # torch.rand(input_dim)
    return dict(dummy=dummy, w1=w1, b1=b1, w2=w2, b2=b2, w3=w3, b3=b3)


if __name__ == "__main__":
    key = jax.random.PRNGKey(0)
    bs, num_ops, num_jobs, num_ma = 16, 12, 5, 3
    embed_dim, hidden_dim = 32, 64

    k1, k2, k3, k4, k5, kp = jax.random.split(key, 6)
    op_emb = jax.random.normal(k1, (bs, num_ops, embed_dim), jnp.float32)
    ma_emb = jax.random.normal(k2, (bs, num_ma, embed_dim), jnp.float32)
    ops_ma_adj = (jax.random.uniform(k3, (bs, num_ma, num_ops)) > 0.5).astype(jnp.float32)
    next_op = jax.random.randint(k4, (bs, num_jobs), 0, num_ops, jnp.int32)
    action_mask = (jax.random.uniform(k5, (bs, num_jobs + 1)) > 0.3)

    params = _init_params(kp, embed_dim, hidden_dim)

    # f32 path: bit-level parity (up to summation order) with the reference.
    logits, mask = jssp_actor_forward(
        next_op, op_emb, ma_emb, ops_ma_adj, action_mask, params)
    logits = jax.block_until_ready(logits)

    # check_nan=True behaviour of the module
    assert not bool(jnp.isnan(logits).any()), "Logits contain NaNs"

    ref = _reference(next_op, op_emb, ma_emb, ops_ma_adj, params)
    assert logits.shape == (bs, num_jobs + 1)
    assert mask.shape == (bs, num_jobs + 1)
    assert jnp.allclose(logits, ref, atol=1e-4, rtol=1e-4), "mismatch vs reference"

    # bf16 MXU-operand path (the v6e/v7x perf knob); loose numeric check only.
    logits_bf16, _ = jssp_actor_forward(
        next_op, op_emb, ma_emb, ops_ma_adj, action_mask, params,
        matmul_dtype=jnp.bfloat16)
    logits_bf16 = jax.block_until_ready(logits_bf16)
    assert logits_bf16.shape == (bs, num_jobs + 1)
    assert not bool(jnp.isnan(logits_bf16).any()), "bf16 logits contain NaNs"
    assert jnp.allclose(logits_bf16, ref, atol=1e-1, rtol=1e-1), "bf16 drift too large"

    print("KERNEL_OK")
</pallas_src>

<mosaic_0001>
module attributes {stable_mosaic.version = 11 : i64} {
  func.func @_mlp_row_kernel(%arg0: i32, %arg1: memref<40x64xf32, #tpu.memory_space<vmem>>, %arg2: memref<64x64xf32, #tpu.memory_space<vmem>>, %arg3: memref<1x64xf32, #tpu.memory_space<vmem>>, %arg4: memref<64x64xf32, #tpu.memory_space<vmem>>, %arg5: memref<1x64xf32, #tpu.memory_space<vmem>>, %arg6: memref<1x64xf32, #tpu.memory_space<vmem>>, %arg7: memref<40x1xf32, #tpu.memory_space<vmem>>) attributes {dimension_semantics = [#tpu.dimension_semantics<parallel>], iteration_bounds = array<i64: 2>, scalar_prefetch = 0 : i64, scratch_operands = 0 : i64, tpu.core_type = #tpu.core_type<tc>, window_params = [{transform_indices = @transform_0, window_bounds = array<i64: 40, 64>}, {pipeline_mode = #tpu.pipeline_mode<synchronous>, transform_indices = @transform_1, window_bounds = array<i64: 64, 64>}, {pipeline_mode = #tpu.pipeline_mode<synchronous>, transform_indices = @transform_2, window_bounds = array<i64: 1, 64>}, {pipeline_mode = #tpu.pipeline_mode<synchronous>, transform_indices = @transform_3, window_bounds = array<i64: 64, 64>}, {pipeline_mode = #tpu.pipeline_mode<synchronous>, transform_indices = @transform_4, window_bounds = array<i64: 1, 64>}, {pipeline_mode = #tpu.pipeline_mode<synchronous>, transform_indices = @transform_5, window_bounds = array<i64: 1, 64>}, {transform_indices = @transform_6, window_bounds = array<i64: 40, 1>}]} {
    %c0 = arith.constant 0 : index
    %c0_0 = arith.constant 0 : index
    %0 = vector.load %arg1[%c0, %c0_0] : memref<40x64xf32, #tpu.memory_space<vmem>>, vector<40x64xf32>
    %c0_1 = arith.constant 0 : index
    %c0_2 = arith.constant 0 : index
    %1 = vector.load %arg2[%c0_1, %c0_2] : memref<64x64xf32, #tpu.memory_space<vmem>>, vector<64x64xf32>
    %cst = arith.constant dense<0.000000e+00> : vector<40x64xf32>
    %2 = tpu.matmul %0, %1, %cst {dimension_numbers = #tpu.dot_dimension_numbers<[1], [0], [0], [1], [0, 0, 1, 1], [], []>} : vector<40x64xf32>, vector<64x64xf32>, vector<40x64xf32> -> vector<40x64xf32>
    %c0_3 = arith.constant 0 : index
    %c0_4 = arith.constant 0 : index
    %3 = vector.load %arg3[%c0_3, %c0_4] : memref<1x64xf32, #tpu.memory_space<vmem>>, vector<1x64xf32>
    %4 = vector.broadcast %3 : vector<1x64xf32> to vector<40x64xf32>
    %5 = arith.addf %2, %4 : vector<40x64xf32>
    %cst_5 = arith.constant 0.000000e+00 : f32
    %6 = vector.broadcast %cst_5 : f32 to vector<40x64xf32>
    %7 = arith.maximumf %5, %6 : vector<40x64xf32>
    %c0_6 = arith.constant 0 : index
    %c0_7 = arith.constant 0 : index
    %8 = vector.load %arg4[%c0_6, %c0_7] : memref<64x64xf32, #tpu.memory_space<vmem>>, vector<64x64xf32>
    %cst_8 = arith.constant dense<0.000000e+00> : vector<40x64xf32>
    %9 = tpu.matmul %7, %8, %cst_8 {dimension_numbers = #tpu.dot_dimension_numbers<[1], [0], [0], [1], [0, 0, 1, 1], [], []>} : vector<40x64xf32>, vector<64x64xf32>, vector<40x64xf32> -> vector<40x64xf32>
    %c0_9 = arith.constant 0 : index
    %c0_10 = arith.constant 0 : index
    %10 = vector.load %arg5[%c0_9, %c0_10] : memref<1x64xf32, #tpu.memory_space<vmem>>, vector<1x64xf32>
    %11 = vector.broadcast %10 : vector<1x64xf32> to vector<40x64xf32>
    %12 = arith.addf %9, %11 : vector<40x64xf32>
    %cst_11 = arith.constant 0.000000e+00 : f32
    %13 = vector.broadcast %cst_11 : f32 to vector<40x64xf32>
    %14 = arith.maximumf %12, %13 : vector<40x64xf32>
    %c0_12 = arith.constant 0 : index
    %c0_13 = arith.constant 0 : index
    %15 = vector.load %arg6[%c0_12, %c0_13] : memref<1x64xf32, #tpu.memory_space<vmem>>, vector<1x64xf32>
    %16 = vector.broadcast %15 : vector<1x64xf32> to vector<40x64xf32>
    %17 = arith.mulf %14, %16 : vector<40x64xf32>
    %cst_14 = arith.constant dense<0.000000e+00> : vector<40xf32>
    %18 = vector.multi_reduction <add>, %17, %cst_14 [1] : vector<40x64xf32> to vector<40xf32>
    %19 = vector.shape_cast %18 : vector<40xf32> to vector<40x1xf32>
    %c0_15 = arith.constant 0 : index
    %c0_16 = arith.constant 0 : index
    %20 = vector.load %arg7[%c0_15, %c0_16] : memref<40x1xf32, #tpu.memory_space<vmem>>, vector<40x1xf32>
    tpu.vector_store %arg7[%c0_15, %c0_16], %19 {strides = array<i32>} : memref<40x1xf32, #tpu.memory_space<vmem>>, vector<40x1xf32>,
    return
  }
  func.func @transform_0(%arg0: i32) -> (i32, i32) {
    %c0_i32 = arith.constant 0 : i32
    %c0_i32_0 = arith.constant 0 : i32
    return %arg0, %c0_i32 : i32, i32
  }
  func.func @transform_1(%arg0: i32) -> (i32, i32) {
    %c0_i32 = arith.constant 0 : i32
    %c0_i32_0 = arith.constant 0 : i32
    %c0_i32_1 = arith.constant 0 : i32
    return %c0_i32, %c0_i32_0 : i32, i32
  }
  func.func @transform_2(%arg0: i32) -> (i32, i32) {
    %c0_i32 = arith.constant 0 : i32
    %c0_i32_0 = arith.constant 0 : i32
    %c0_i32_1 = arith.constant 0 : i32
    return %c0_i32, %c0_i32_0 : i32, i32
  }
  func.func @transform_3(%arg0: i32) -> (i32, i32) {
    %c0_i32 = arith.constant 0 : i32
    %c0_i32_0 = arith.constant 0 : i32
    %c0_i32_1 = arith.constant 0 : i32
    return %c0_i32, %c0_i32_0 : i32, i32
  }
  func.func @transform_4(%arg0: i32) -> (i32, i32) {
    %c0_i32 = arith.constant 0 : i32
    %c0_i32_0 = arith.constant 0 : i32
    %c0_i32_1 = arith.constant 0 : i32
    return %c0_i32, %c0_i32_0 : i32, i32
  }
  func.func @transform_5(%arg0: i32) -> (i32, i32) {
    %c0_i32 = arith.constant 0 : i32
    %c0_i32_0 = arith.constant 0 : i32
    %c0_i32_1 = arith.constant 0 : i32
    return %c0_i32, %c0_i32_0 : i32, i32
  }
  func.func @transform_6(%arg0: i32) -> (i32, i32) {
    %c0_i32 = arith.constant 0 : i32
    %c0_i32_0 = arith.constant 0 : i32
    return %arg0, %c0_i32 : i32, i32
  }
}

</mosaic_0001>

<bundles_post_ra>
// kernel: tpu_custom_call.1
= control target key start
LH: loop header
LB: loop body
LE: loop exit
PB: predicated region body
PF: predicated region fallthrough
CT: control target
= control target key end

     0   :  { %s765_s21 = smov 0   ;;  %s897_s0 = inlined_call_operand.vmem [shape: f32[80,64], index: 0, kind: input, shape index: {}]   ;;  %s898_s1 = inlined_call_operand.vmem [shape: f32[64,64], index: 1, kind: input, shape index: {}]   ;;  %s899_s2 = inlined_call_operand.vmem [shape: f32[1,64], index: 2, kind: input, shape index: {}]   ;;  %s900_s3 = inlined_call_operand.vmem [shape: f32[64,64], index: 3, kind: input, shape index: {}]   ;;  %s901_s4 = inlined_call_operand.vmem [shape: f32[1,64], index: 4, kind: input, shape index: {}]   ;;  %s902_s5 = inlined_call_operand.vmem [shape: f32[1,64], index: 5, kind: input, shape index: {}]   ;;  %s903_s6 = inlined_call_operand.vmem [shape: f32[80,1], index: 6, kind: output, shape index: {}]  }
   0x1 LB: > { %s600_s22 = sadd.s32 4294967295, %s726_s21   ;;  %p604_p0 = scmp.ge.s32.totalorder %s726_s21, 1  ;;  %s726_s21 = sphi %s765_s21, %s16_s21  }
   0x2   : > { %p213_p1 = scmp.lt.s32.totalorder %s726_s21, 3 }
   0x4   : > { %p214_p2 = pnand %p604_p0, %p213_p1 }
   0x5   : > { %s243_s25 = smul.u32 (!%p214_p2), 5, %s600_s22 }
   0x6   : > { %217 = sbr.rel (%p214_p2) target bundleno = 580 (0x244), region = 44 }
   0x7   : > { %p244_p3 = scmp.lt.s32.totalorder (!%p214_p2), %s243_s25, 9 }
   0xb   : > { %v267_v0 = vld [vmem:[%s898_s1 + $0x38] sm:$0xff]  ;;  %v728_v1 = vmov 0.0   ;;  %v266_v2 = vld [vmem:[%s898_s1 + $0x30] sm:$0xff]  ;;  %vm729_vm0 = vmmov 0   ;;  %v265_v4 = vld [vmem:[%s898_s1 + $0x28] sm:$0xff]  ;;  %s905_s25 = smov (!%p244_p3, %s243_s25), 9 }
   0xc   : > { %648 = vmatprep.subr.mxu0 %v728_v1  ;;  %664 = vmatprep.mubr.msk.f32.mxu0 %vm729_vm0, %v728_v1  ;;  %v393_v3 = vld [vmem:[%s900_s3 + $0x38] sm:$0xff]  ;;  %v392_v5 = vld [vmem:[%s900_s3 + $0x30] sm:$0xff]  ;;  %v391_v6 = vld [vmem:[%s900_s3 + $0x28] sm:$0xff]  ;;  %s605_s18 = sshll.u32 %s905_s25, 3  ;;  %vm275_vm1 = vcmask 523264   ;;  %vm538_vm2 = vcmask 7168  }
   0xd   : > { %649 = vmatpush3.msra.mxu0 %v267_v0  ;;  %679 = vmatprep.subr.mxu1 %v728_v1  ;;  %v264_v7 = vld [vmem:[%s898_s1 + $0x20] sm:$0xff]  ;;  %v263_v9 = vld [vmem:[%s898_s1 + $0x18] sm:$0xff]  ;;  %v262_v11 = vld [vmem:[%s898_s1 + $0x10] sm:$0xff]  ;;  %s247_s29 = scalar_lea.vmem %s897_s0, %s605_s18  ;;  %s253_s24 = scalar_lea.vmem %s903_s6, %s605_s18 }
   0xe   : > { %650 = vmatprep.subr.mxu0 %v728_v1  ;;  %680 = vmatpush3.msra.mxu1 %v393_v3  ;;  %v390_v8 = vld [vmem:[%s900_s3 + $0x20] sm:$0xff]  ;;  %v389_v10 = vld [vmem:[%s900_s3 + $0x18] sm:$0xff]  ;;  %v261_v12 = vld [vmem:[%s898_s1 + $0x8] sm:$0xff] }
   0xf   : > { %651 = vmatpush3.msra.mxu0 %v266_v2  ;;  %681 = vmatprep.subr.mxu1 %v728_v1  ;;  %v260_v13 = vld [vmem:[%s898_s1] sm:$0xff]  ;;  %v256_v15 = vld [vmem:[%s247_s29 + $0x8] sm:$0xff]  ;;  %v257_v16 = vld [vmem:[%s247_s29 + $0x10] sm:$0xff] }
  0x10   : > { %652 = vmatprep.subr.mxu0 %v728_v1  ;;  %682 = vmatpush3.msra.mxu1 %v392_v5  ;;  %v255_v14 = vld [vmem:[%s247_s29] sm:$0xff]  ;;  %v258_v17 = vld [vmem:[%s247_s29 + $0x18] sm:$0xff]  ;;  %v388_v19 = vld [vmem:[%s900_s3 + $0x10] sm:$0xff] }
  0x11   : > { %653 = vmatpush3.msra.mxu0 %v265_v4  ;;  %683 = vmatprep.subr.mxu1 %v728_v1  ;;  %v259_v18 = vld [vmem:[%s247_s29 + $0x20] sm:$0xff]  ;;  %v387_v20 = vld [vmem:[%s900_s3 + $0x8] sm:$0xff] }
  0x12   : > { %654 = vmatprep.subr.mxu0 %v728_v1  ;;  %684 = vmatpush3.msra.mxu1 %v391_v6  ;;  %v386_v21 = vld [vmem:[%s900_s3] sm:$0xff] }
  0x13   : > { %655 = vmatpush3.msra.mxu0 %v264_v7  ;;  %685 = vmatprep.subr.mxu1 %v728_v1  ;;  %v607_v22 = vld [vmem:[%s899_s2] ss:$0 sm:$0xff] }
  0x14   : > { %656 = vmatprep.subr.mxu0 %v728_v1  ;;  %686 = vmatpush3.msra.mxu1 %v390_v8  ;;  %v613_v43 = vld [vmem:[%s901_s4] ss:$0 sm:$0xff] }
  0x15   : > { %657 = vmatpush3.msra.mxu0 %v263_v9  ;;  %687 = vmatprep.subr.mxu1 %v728_v1  ;;  %v619_v47 = vld [vmem:[%s902_s5] ss:$0 sm:$0xff] }
  0x16   : > { %658 = vmatprep.subr.mxu0 %v728_v1  ;;  %688 = vmatpush3.msra.mxu1 %v389_v10 }
  0x17   : > { %659 = vmatpush3.msra.mxu0 %v262_v11  ;;  %689 = vmatprep.subr.mxu1 %v728_v1 }
  0x18   : > { %660 = vmatprep.subr.mxu0 %v728_v1  ;;  %695 = vmatprep.mubr.msk.f32.mxu1 %vm729_vm0, %v728_v1 }
  0x19   : > { %661 = vmatpush3.msra.mxu0 %v261_v12  ;;  %690 = vmatpush3.msra.mxu1 %v388_v19 }
  0x1a   : > { %662 = vmatprep.subr.mxu0 %v728_v1  ;;  %691 = vmatprep.subr.mxu1 %v728_v1 }
  0x1b   : > { %663 = vmatpush3.msra.mxu0 %v260_v13  ;;  %692 = vmatpush3.msra.mxu1 %v387_v20 }
  0x1c   : > { %665 = vmatmul.mubr.msk.f32.vlgmr.msra.gmra.mxu0 %vm275_vm1, %v255_v14  ;;  %693 = vmatprep.subr.mxu1 %v728_v1 }
  0x1d   : > { %667 = vmatprep.mubr.msk.f32.mxu0 %vm729_vm0, %v728_v1  ;;  %694 = vmatpush3.msra.mxu1 %v386_v21 }
  0x20   : > { %668 = vmatmul.mubr.msk.f32.gmra.mxu0 %vm275_vm1, %v256_v15 }
  0x21   : > { %670 = vmatprep.mubr.msk.f32.mxu0 %vm729_vm0, %v728_v1 }
  0x24   : > { %671 = vmatmul.mubr.msk.f32.gmra.mxu0 %vm275_vm1, %v257_v16 }
  0x25   : > { %673 = vmatprep.mubr.msk.f32.mxu0 %vm729_vm0, %v728_v1 }
  0x28   : > { %674 = vmatmul.mubr.msk.f32.gmra.mxu0 %vm275_vm1, %v258_v17 }
  0x29   : > { %676 = vmatprep.mubr.msk.f32.mxu0 %vm729_vm0, %v728_v1 }
  0x2c   : > { %677 = vmatmul.mubr.msk.f32.gmra.mxu0 %vm275_vm1, %v259_v18 }
  0xdc   : > { %v357_v23 = vpop.f32.mrf.mxu0 }
  0xdd   : > { %v358_v24 = vadd.f32 %v607_v22, %v357_v23 }
  0xde   : > { %v666_v25 = vpop.f32.mrf.mxu0 }
  0xdf   : > { %v381_v26 = vmax.f32 %v358_v24, 0.0 }
  0xe0   : > { %v362_v27 = vpop.f32.mrf.mxu0 }
  0xe1   : > { %v363_v28 = vadd.f32 %v607_v22, %v362_v27  ;;  %696 = vmatmul.mubr.msk.f32.vlgmr.msra.gmra.mxu1 %vm275_vm1, %v381_v26 }
  0xe2   : > { %v669_v29 = vpop.f32.mrf.mxu0  ;;  %698 = vmatprep.mubr.msk.f32.mxu1 %vm729_vm0, %v728_v1 }
  0xe3   : > { %v382_v30 = vmax.f32 %v363_v28, 0.0 }
  0xe4   : > { %v367_v31 = vpop.f32.mrf.mxu0 }
  0xe5   : > { %v368_v32 = vadd.f32 %v607_v22, %v367_v31  ;;  %699 = vmatmul.mubr.msk.f32.gmra.mxu1 %vm275_vm1, %v382_v30 }
  0xe6   : > { %v672_v33 = vpop.f32.mrf.mxu0  ;;  %701 = vmatprep.mubr.msk.f32.mxu1 %vm729_vm0, %v728_v1 }
  0xe7   : > { %v383_v34 = vmax.f32 %v368_v32, 0.0 }
  0xe8   : > { %v372_v35 = vpop.f32.mrf.mxu0 }
  0xe9   : > { %v373_v36 = vadd.f32 %v607_v22, %v372_v35  ;;  %702 = vmatmul.mubr.msk.f32.gmra.mxu1 %vm275_vm1, %v383_v34 }
  0xea   : > { %v675_v37 = vpop.f32.mrf.mxu0  ;;  %704 = vmatprep.mubr.msk.f32.mxu1 %vm729_vm0, %v728_v1 }
  0xeb   : > { %v384_v38 = vmax.f32 %v373_v36, 0.0 }
  0xec   : > { %v377_v39 = vpop.f32.mrf.mxu0 }
  0xed   : > { %v378_v40 = vadd.f32 %v607_v22, %v377_v39  ;;  %705 = vmatmul.mubr.msk.f32.gmra.mxu1 %vm275_vm1, %v384_v38 }
  0xee   : > { %v678_v41 = vpop.f32.mrf.mxu0  ;;  %707 = vmatprep.mubr.msk.f32.mxu1 %vm729_vm0, %v728_v1 }
  0xef   : > { %v385_v42 = vmax.f32 %v378_v40, 0.0 }
  0xf1   : > { %708 = vmatmul.mubr.msk.f32.gmra.mxu1 %vm275_vm1, %v385_v42 }
 0x1a1   : > { %v482_v44 = vpop.f32.mrf.mxu1 }
 0x1a2   : > { %v483_v45 = vadd.f32 %v613_v43, %v482_v44 }
 0x1a3   : > { %v697_v46 = vpop.f32.mrf.mxu1 }
 0x1a4   : > { %v506_v48 = vmax.f32 %v483_v45, 0.0 }
 0x1a5   : > { %v487_v49 = vpop.f32.mrf.mxu1 }
 0x1a6   : > { %v488_v50 = vadd.f32 %v613_v43, %v487_v49  ;;  %v518_v51 = vmul.f32 %v619_v47, %v506_v48 }
 0x1a7   : > { %v700_v52 = vpop.f32.mrf.mxu1 }
 0x1a8   : > { %v507_v53 = vmax.f32 %v488_v50, 0.0  ;;  %v523_v54 = vsel %vm275_vm1, %v518_v51, 0.0 }
 0x1a9   : > { %524 = vadd.xlane.f32.xlu0 %v523_v54  ;;  %v492_v55 = vpop.f32.mrf.mxu1 }
 0x1aa   : > { %v493_v56 = vadd.f32 %v613_v43, %v492_v55  ;;  %v519_v57 = vmul.f32 %v619_v47, %v507_v53 }
 0x1ab   : > { %v703_v58 = vpop.f32.mrf.mxu1 }
 0x1ac   : > { %v508_v59 = vmax.f32 %v493_v56, 0.0  ;;  %v526_v60 = vsel %vm275_vm1, %v519_v57, 0.0 }
 0x1ad   : > { %527 = vadd.xlane.f32.xlu0 %v526_v60  ;;  %v497_v61 = vpop.f32.mrf.mxu1 }
 0x1ae   : > { %v498_v62 = vadd.f32 %v613_v43, %v497_v61  ;;  %v520_v63 = vmul.f32 %v619_v47, %v508_v59 }
 0x1af   : > { %v706_v0 = vpop.f32.mrf.mxu1 }
 0x1b0   : > { %v509_v1 = vmax.f32 %v498_v62, 0.0  ;;  %v529_v2 = vsel %vm275_vm1, %v520_v63, 0.0 }
 0x1b1   : > { %530 = vadd.xlane.f32.xlu1 %v529_v2  ;;  %v502_v3 = vpop.f32.mrf.mxu1 }
 0x1b2   : > { %v503_v4 = vadd.f32 %v613_v43, %v502_v3  ;;  %v521_v5 = vmul.f32 %v619_v47, %v509_v1 }
 0x1b3   : > { %v709_v6 = vpop.f32.mrf.mxu1 }
 0x1b4   : > { %v510_v7 = vmax.f32 %v503_v4, 0.0  ;;  %v532_v8 = vsel %vm275_vm1, %v521_v5, 0.0 }
 0x1b5   : > { %533 = vadd.xlane.f32.xlu1 %v532_v8 }
 0x1b6   : > { %v522_v9 = vmul.f32 %v619_v47, %v510_v7 }
 0x1b8   : > { %v535_v10 = vsel %vm275_vm1, %v522_v9, 0.0 }
 0x1b9   : > { %536 = vadd.xlane.f32.xlu0 %v535_v10 }
 0x232   : > { %v525_v11 = vpop.xlane.xlu0 %524 }
 0x233   : > { %539 = vst.msk [vmem:[%s253_s24] sm:$0xff] %vm538_vm2, %v525_v11 }
 0x236   : > { %v528_v12 = vpop.xlane.xlu0 %527 }
 0x237   : > { %540 = vst.msk [vmem:[%s253_s24 + $0x8] sm:$0xff] %vm538_vm2, %v528_v12 }
 0x23a   : > { %v531_v13 = vpop.xlane.xlu1 %530 }
 0x23b   : > { %541 = vst.msk [vmem:[%s253_s24 + $0x10] sm:$0xff] %vm538_vm2, %v531_v13 }
 0x23e   : > { %v534_v14 = vpop.xlane.xlu1 %533 }
 0x23f   : > { %542 = vst.msk [vmem:[%s253_s24 + $0x18] sm:$0xff] %vm538_vm2, %v534_v14 }
 0x242   : > { %v537_v15 = vpop.xlane.xlu0 %536 }
 0x243   : > { %543 = vst.msk [vmem:[%s253_s24 + $0x20] sm:$0xff] %vm538_vm2, %v537_v15 }
 0x244 PF: > { %s16_s21 = sadd.s32 1, %s726_s21  }
 0x245   : > { %p13_p4 = scmp.ge.s32.totalorder %s16_s21, 4  }
 0x247   :  { %15 = sbr.rel (!%p13_p4) target bundleno = 1 (0x1), region = 74 }

</bundles_post_ra>
